<compile_context>
chip_gen: v7x
topology: tpu7x:2x2x1
jax: 0.10.0
libtpu: 0.0.40
codegen_flags: <defaults>
</compile_context>

<pallas_src>
import jax
import jax.numpy as jnp
from jax.experimental import pallas as pl
from jax.experimental.pallas import tpu as pltpu


def _round_up(v: int, m: int) -> int:
    return (v + m - 1) // m * m


def _vmem_budget_bytes() -> int:
    """Usable VMEM budget: physical capacity minus ~8 MiB headroom, capped at 100 MiB."""
    cap = 64 << 20  # conservative fallback (v7x per-TC VMEM)
    try:
        cap = int(pltpu.get_tpu_info().vmem_capacity_bytes)
    except Exception:
        pass
    return max(32 << 20, min(cap - (8 << 20), 100 << 20))


# --------------------------------------------------------------------------------------
# Kernels
# --------------------------------------------------------------------------------------
def _sae_kernel_resident(x_ref, w_enc_ref, b_enc_ref, w_dec_ref, b_dec_ref,
                         enc_ref, dec_ref):
    """Weights fully VMEM-resident (block indices constant) -> DMA'd once per kernel."""
    x = x_ref[...]                                                    # (tm, d_p)
    enc = jnp.dot(x, w_enc_ref[...], preferred_element_type=jnp.float32)
    enc = jnp.maximum(enc + b_enc_ref[...], 0.0)                      # bias + ReLU
    enc_ref[...] = enc.astype(enc_ref.dtype)
    dec = jnp.dot(enc.astype(w_dec_ref.dtype), w_dec_ref[...],
                  preferred_element_type=jnp.float32)
    dec_ref[...] = (dec + b_dec_ref[...]).astype(dec_ref.dtype)


def _sae_kernel_streamed_f32out(x_ref, w_enc_ref, b_enc_ref, w_dec_ref, b_dec_ref,
                                enc_ref, dec_ref):
    """s-slab streaming; decode accumulates directly into the f32 decoded output tile
    (its block index is constant in j, so it stays VMEM-resident across slabs)."""
    j = pl.program_id(1)
    x = x_ref[...]
    enc = jnp.dot(x, w_enc_ref[...], preferred_element_type=jnp.float32)
    enc = jnp.maximum(enc + b_enc_ref[...], 0.0)
    enc_ref[...] = enc.astype(enc_ref.dtype)

    @pl.when(j == 0)
    def _():
        dec_ref[...] = jnp.zeros_like(dec_ref)

    dec_ref[...] += jnp.dot(enc.astype(w_dec_ref.dtype), w_dec_ref[...],
                            preferred_element_type=jnp.float32)

    @pl.when(j == pl.num_programs(1) - 1)
    def _():
        dec_ref[...] += b_dec_ref[...]


def _sae_kernel_streamed_acc(x_ref, w_enc_ref, b_enc_ref, w_dec_ref, b_dec_ref,
                             enc_ref, dec_ref, acc_ref):
    """s-slab streaming with a separate f32 scratch accumulator (non-f32 decoded out)."""
    j = pl.program_id(1)
    x = x_ref[...]
    enc = jnp.dot(x, w_enc_ref[...], preferred_element_type=jnp.float32)
    enc = jnp.maximum(enc + b_enc_ref[...], 0.0)
    enc_ref[...] = enc.astype(enc_ref.dtype)

    @pl.when(j == 0)
    def _():
        acc_ref[...] = jnp.zeros_like(acc_ref)

    acc_ref[...] += jnp.dot(enc.astype(w_dec_ref.dtype), w_dec_ref[...],
                            preferred_element_type=jnp.float32)

    @pl.when(j == pl.num_programs(1) - 1)
    def _():
        dec_ref[...] = (acc_ref[...] + b_dec_ref[...]).astype(dec_ref.dtype)


# --------------------------------------------------------------------------------------
# Wrapper / factory
# --------------------------------------------------------------------------------------
def make_vanilla_sae_forward(w_enc, b_enc, w_dec, b_dec, *,
                             tm: int = 512, ts: int = 512,
                             compute_dtype=jnp.bfloat16,
                             enc_dtype=None, dec_dtype=None,
                             force_streamed: bool = False):
    """Returns forward(x: [b, n, d]) -> (encoded [b, n, s], decoded [b, n, d]).

    Parameters are padded to lane-dense shapes and cast to `compute_dtype` ONCE here,
    not on every forward call.  `enc_dtype` defaults to `compute_dtype` (bf16) to halve
    the encoded HBM write; `dec_dtype` defaults to x.dtype.
    """
    d, s = w_enc.shape
    assert w_dec.shape == (s, d) and b_enc.shape == (s,) and b_dec.shape == (d,)

    d_p = _round_up(d, 128)
    s_p = _round_up(s, 128)

    # ---- pad + cast parameters once (zero-padded extras are numerically inert) ------
    w_enc_p = jnp.pad(jnp.asarray(w_enc), ((0, d_p - d), (0, s_p - s))).astype(compute_dtype)
    w_dec_p = jnp.pad(jnp.asarray(w_dec), ((0, s_p - s), (0, d_p - d))).astype(compute_dtype)
    b_enc_p = jnp.pad(jnp.asarray(b_enc), (0, s_p - s)).astype(jnp.float32).reshape(1, s_p)
    b_dec_p = jnp.pad(jnp.asarray(b_dec), (0, d_p - d)).astype(jnp.float32).reshape(1, d_p)

    vmem_budget = _vmem_budget_bytes()
    cbytes = jnp.dtype(compute_dtype).itemsize
    enc_dt = compute_dtype if enc_dtype is None else enc_dtype
    enc_b = jnp.dtype(enc_dt).itemsize

    @jax.jit
    def _fwd(x, w_enc_p, b_enc_p, w_dec_p, b_dec_p):
        b, n, d_in = x.shape
        assert d_in == d
        M = b * n
        dec_dt = x.dtype if dec_dtype is None else jnp.dtype(dec_dtype)
        dec_b = jnp.dtype(dec_dt).itemsize
        f32_direct = jnp.dtype(dec_dt) == jnp.dtype(jnp.float32)

        # ---- VMEM working-set models (double-buffered pipeline tiles) ---------------
        bias_buf = 2 * 8 * s_p * 4 + 2 * 8 * d_p * 4   # (1, N) bias blocks pad to 8 sublanes

        def resident_bytes(tm_):
            return (2 * tm_ * d_p * cbytes             # x row tile
                    + 2 * d_p * s_p * cbytes           # W_enc (resident; 2 bufs assumed)
                    + 2 * s_p * d_p * cbytes           # W_dec
                    + bias_buf
                    + 2 * tm_ * s_p * enc_b            # encoded out tile
                    + 2 * tm_ * d_p * dec_b)           # decoded out tile

        def streamed_bytes(tm_, ts_):
            acc = 0 if f32_direct else tm_ * d_p * 4
            return (2 * tm_ * d_p * cbytes
                    + 2 * d_p * ts_ * cbytes
                    + 2 * ts_ * d_p * cbytes
                    + 2 * 8 * ts_ * 4 + 2 * 8 * d_p * 4
                    + 2 * tm_ * ts_ * enc_b
                    + 2 * tm_ * d_p * dec_b
                    + acc)

        # ---- row tile ----------------------------------------------------------------
        tm_eff = _round_up(max(16, min(tm, _round_up(M, 16))), 16)
        if M > 256 and _round_up(M, tm_eff) // tm_eff < 2:
            # keep >= 2 row tiles so v7x megacore can shard axis 0
            tm_eff = _round_up(-(-M // 2), 16)

        # ---- weight-resident (single s slab) vs streamed -------------------------------
        use_resident = False
        if not force_streamed:
            candidates = [tm_eff]
            if tm_eff >= 256:
                candidates.append(max(128, _round_up(tm_eff // 2, 16)))
            for tm_cand in candidates:
                if resident_bytes(tm_cand) <= vmem_budget:
                    use_resident = True
                    tm_eff = tm_cand
                    break

        ts_eff = s_p
        if not use_resident:
            # ts must divide s_p exactly (no wasted padded slab columns)
            ts_req = max(128, min(_round_up(ts, 128), s_p))
            cand_ts = [k * 128 for k in range(s_p // 128, 0, -1)
                       if s_p % (k * 128) == 0 and k * 128 <= ts_req]
            ts_eff = cand_ts[-1]                          # smallest (=128) as fallback
            for t in cand_ts:                             # largest that fits the budget
                if streamed_bytes(tm_eff, t) <= vmem_budget:
                    ts_eff = t
                    break
            while streamed_bytes(tm_eff, ts_eff) > vmem_budget and tm_eff > 64:
                tm_eff = _round_up(max(16, tm_eff // 2), 16)

        M_p = _round_up(M, tm_eff)
        n_row_tiles = M_p // tm_eff

        # ---- prepare activation slab ---------------------------------------------------
        x2 = jnp.pad(x.reshape(M, d), ((0, M_p - M), (0, d_p - d))).astype(compute_dtype)

        flops = 4 * M_p * d_p * s_p                      # two matmuls, 2*M*K*N each
        bias_hbm = (s_p + d_p) * 4
        io_hbm = M_p * d_p * cbytes + M_p * s_p * enc_b + M_p * d_p * dec_b
        weight_hbm = 2 * d_p * s_p * cbytes

        if use_resident:
            vmem_needed = resident_bytes(tm_eff)
            cost = pl.CostEstimate(flops=flops, transcendentals=0,
                                   bytes_accessed=io_hbm + weight_hbm + bias_hbm)
            grid_spec = pltpu.PrefetchScalarGridSpec(
                num_scalar_prefetch=0,
                grid=(n_row_tiles,),
                in_specs=[
                    pl.BlockSpec((tm_eff, d_p), lambda i: (i, 0)),   # x row tile
                    pl.BlockSpec((d_p, s_p), lambda i: (0, 0)),      # W_enc (resident)
                    pl.BlockSpec((1, s_p), lambda i: (0, 0)),        # b_enc
                    pl.BlockSpec((s_p, d_p), lambda i: (0, 0)),      # W_dec (resident)
                    pl.BlockSpec((1, d_p), lambda i: (0, 0)),        # b_dec
                ],
                out_specs=[
                    pl.BlockSpec((tm_eff, s_p), lambda i: (i, 0)),   # encoded
                    pl.BlockSpec((tm_eff, d_p), lambda i: (i, 0)),   # decoded
                ],
                scratch_shapes=[],
            )
            kernel = _sae_kernel_resident
            dims = ("parallel",)
        else:
            n_s_tiles = s_p // ts_eff
            kernel = _sae_kernel_streamed_f32out if f32_direct else _sae_kernel_streamed_acc
            scratch = [] if f32_direct else [pltpu.VMEM((tm_eff, d_p), jnp.float32)]
            vmem_needed = streamed_bytes(tm_eff, ts_eff)
            cost = pl.CostEstimate(
                flops=flops, transcendentals=0,
                bytes_accessed=io_hbm + weight_hbm * n_row_tiles + bias_hbm)  # re-stream factor
            grid_spec = pltpu.PrefetchScalarGridSpec(
                num_scalar_prefetch=0,
                grid=(n_row_tiles, n_s_tiles),
                in_specs=[
                    pl.BlockSpec((tm_eff, d_p), lambda i, j: (i, 0)),    # x (constant in j)
                    pl.BlockSpec((d_p, ts_eff), lambda i, j: (0, j)),    # W_enc s-slab
                    pl.BlockSpec((1, ts_eff), lambda i, j: (0, j)),      # b_enc s-slab
                    pl.BlockSpec((ts_eff, d_p), lambda i, j: (j, 0)),    # W_dec s-slab
                    pl.BlockSpec((1, d_p), lambda i, j: (0, 0)),         # b_dec
                ],
                out_specs=[
                    pl.BlockSpec((tm_eff, ts_eff), lambda i, j: (i, j)),  # encoded tile
                    pl.BlockSpec((tm_eff, d_p), lambda i, j: (i, 0)),     # decoded (acc over j)
                ],
                scratch_shapes=scratch,
            )
            dims = ("parallel", "arbitrary")

        vmem_limit = max(32 << 20, min(vmem_budget, int(vmem_needed * 1.5) + (4 << 20)))

        enc2, dec2 = pl.pallas_call(
            kernel,
            out_shape=(jax.ShapeDtypeStruct((M_p, s_p), enc_dt),
                       jax.ShapeDtypeStruct((M_p, d_p), dec_dt)),
            grid_spec=grid_spec,
            compiler_params=pltpu.CompilerParams(
                dimension_semantics=dims,
                vmem_limit_bytes=vmem_limit),
            cost_estimate=cost,
        )(x2, w_enc_p, b_enc_p, w_dec_p, b_dec_p)

        encoded = enc2[:M, :s].reshape(b, n, s)
        decoded = dec2[:M, :d].reshape(b, n, d)
        return encoded, decoded

    def forward(x):
        return _fwd(x, w_enc_p, b_enc_p, w_dec_p, b_dec_p)

    return forward


if __name__ == "__main__":
    # Small shapes consistent with 'b n d' -> 'b n s'
    B, N, D, S = 2, 8, 32, 256     # batch, seq, embed_dim, sparse_dim

    key = jax.random.PRNGKey(0)
    kx, kwe, kbe, kwd, kbd = jax.random.split(key, 5)

    x = jax.random.normal(kx, (B, N, D), dtype=jnp.float32)
    # Deterministic synthetic parameters (nn.Linear-equivalent, stored [in, out]
    # so forward is x @ W + b).
    w_enc = jax.random.normal(kwe, (D, S), dtype=jnp.float32) * (1.0 / D ** 0.5)
    b_enc = jax.random.normal(kbe, (S,), dtype=jnp.float32) * 0.01
    w_dec = jax.random.normal(kwd, (S, D), dtype=jnp.float32) * (1.0 / S ** 0.5)
    b_dec = jax.random.normal(kbd, (D,), dtype=jnp.float32) * 0.01

    # Pure-JAX reference (same math, no Pallas).
    enc_ref = jnp.maximum(jnp.einsum("bnd,ds->bns", x, w_enc) + b_enc, 0.0)
    dec_ref = jnp.einsum("bns,sd->bnd", enc_ref, w_dec) + b_dec

    # 1) f32 operands, weight-resident path.
    fwd32 = make_vanilla_sae_forward(w_enc, b_enc, w_dec, b_dec,
                                     compute_dtype=jnp.float32)
    enc32, dec32 = fwd32(x)
    jax.block_until_ready((enc32, dec32))
    assert enc32.shape == (B, N, S) and dec32.shape == (B, N, D)
    assert jnp.allclose(enc32, enc_ref, atol=1e-2, rtol=1e-2)
    assert jnp.allclose(dec32, dec_ref, atol=1e-2, rtol=1e-2)

    # 2) Production path: bf16 MXU operands, weight-resident, bf16 encoded output.
    fwd16 = make_vanilla_sae_forward(w_enc, b_enc, w_dec, b_dec)
    enc16, dec16 = fwd16(x)
    jax.block_until_ready((enc16, dec16))
    assert enc16.dtype == jnp.bfloat16 and dec16.dtype == x.dtype
    assert jnp.allclose(enc16.astype(jnp.float32), enc_ref, atol=5e-2, rtol=5e-2)
    assert jnp.allclose(dec16, dec_ref, atol=5e-2, rtol=5e-2)

    # 3) Forced s-slab streaming (2 slabs), f32 decoded -> direct accumulation into output.
    fwd_s = make_vanilla_sae_forward(w_enc, b_enc, w_dec, b_dec, ts=128,
                                     force_streamed=True)
    enc_s, dec_s = fwd_s(x)
    jax.block_until_ready((enc_s, dec_s))
    assert jnp.allclose(enc_s.astype(jnp.float32), enc_ref, atol=5e-2, rtol=5e-2)
    assert jnp.allclose(dec_s, dec_ref, atol=5e-2, rtol=5e-2)

    # 4) Forced streaming with bf16 decoded output -> f32 scratch-accumulator kernel.
    fwd_sb = make_vanilla_sae_forward(w_enc, b_enc, w_dec, b_dec, ts=128,
                                      force_streamed=True, dec_dtype=jnp.bfloat16)
    enc_sb, dec_sb = fwd_sb(x)
    jax.block_until_ready((enc_sb, dec_sb))
    assert jnp.allclose(dec_sb.astype(jnp.float32), dec_ref, atol=5e-2, rtol=5e-2)

    # TODO(synk): get_losses() / flops are training-side abstract hooks with no kernel
    # equivalent; only the forward (encode -> ReLU -> decode) is implemented.
    print("KERNEL_OK")
</pallas_src>

<mosaic_0001>
module attributes {stable_mosaic.version = 11 : i64} {
  func.func @_sae_kernel_resident(%arg0: i32, %arg1: memref<16x128xf32, #tpu.memory_space<vmem>>, %arg2: memref<128x256xf32, #tpu.memory_space<vmem>>, %arg3: memref<1x256xf32, #tpu.memory_space<vmem>>, %arg4: memref<256x128xf32, #tpu.memory_space<vmem>>, %arg5: memref<1x128xf32, #tpu.memory_space<vmem>>, %arg6: memref<16x256xf32, #tpu.memory_space<vmem>>, %arg7: memref<16x128xf32, #tpu.memory_space<vmem>>) attributes {dimension_semantics = [#tpu.dimension_semantics<parallel>], iteration_bounds = array<i64: 1>, scalar_prefetch = 0 : i64, scratch_operands = 0 : i64, tpu.core_type = #tpu.core_type<tc>, window_params = [{transform_indices = @transform_0, window_bounds = array<i64: 16, 128>}, {pipeline_mode = #tpu.pipeline_mode<synchronous>, transform_indices = @transform_1, window_bounds = array<i64: 128, 256>}, {pipeline_mode = #tpu.pipeline_mode<synchronous>, transform_indices = @transform_2, window_bounds = array<i64: 1, 256>}, {pipeline_mode = #tpu.pipeline_mode<synchronous>, transform_indices = @transform_3, window_bounds = array<i64: 256, 128>}, {pipeline_mode = #tpu.pipeline_mode<synchronous>, transform_indices = @transform_4, window_bounds = array<i64: 1, 128>}, {transform_indices = @transform_5, window_bounds = array<i64: 16, 256>}, {transform_indices = @transform_6, window_bounds = array<i64: 16, 128>}]} {
    %c0 = arith.constant 0 : index
    %c0_0 = arith.constant 0 : index
    %0 = vector.load %arg1[%c0, %c0_0] : memref<16x128xf32, #tpu.memory_space<vmem>>, vector<16x128xf32>
    %c0_1 = arith.constant 0 : index
    %c0_2 = arith.constant 0 : index
    %1 = vector.load %arg2[%c0_1, %c0_2] : memref<128x256xf32, #tpu.memory_space<vmem>>, vector<128x256xf32>
    %cst = arith.constant dense<0.000000e+00> : vector<16x256xf32>
    %2 = tpu.matmul %0, %1, %cst {dimension_numbers = #tpu.dot_dimension_numbers<[1], [0], [0], [1], [0, 0, 1, 1], [], []>} : vector<16x128xf32>, vector<128x256xf32>, vector<16x256xf32> -> vector<16x256xf32>
    %c0_3 = arith.constant 0 : index
    %c0_4 = arith.constant 0 : index
    %3 = vector.load %arg3[%c0_3, %c0_4] : memref<1x256xf32, #tpu.memory_space<vmem>>, vector<1x256xf32>
    %4 = vector.broadcast %3 : vector<1x256xf32> to vector<16x256xf32>
    %5 = arith.addf %2, %4 : vector<16x256xf32>
    %cst_5 = arith.constant 0.000000e+00 : f32
    %6 = vector.broadcast %cst_5 : f32 to vector<16x256xf32>
    %7 = arith.maximumf %5, %6 : vector<16x256xf32>
    %c0_6 = arith.constant 0 : index
    %c0_7 = arith.constant 0 : index
    %8 = vector.load %arg6[%c0_6, %c0_7] : memref<16x256xf32, #tpu.memory_space<vmem>>, vector<16x256xf32>
    tpu.vector_store %arg6[%c0_6, %c0_7], %7 {strides = array<i32>} : memref<16x256xf32, #tpu.memory_space<vmem>>, vector<16x256xf32>,
    %c0_8 = arith.constant 0 : index
    %c0_9 = arith.constant 0 : index
    %9 = vector.load %arg4[%c0_8, %c0_9] : memref<256x128xf32, #tpu.memory_space<vmem>>, vector<256x128xf32>
    %cst_10 = arith.constant dense<0.000000e+00> : vector<16x128xf32>
    %10 = tpu.matmul %7, %9, %cst_10 {dimension_numbers = #tpu.dot_dimension_numbers<[1], [0], [0], [1], [0, 0, 1, 1], [], []>} : vector<16x256xf32>, vector<256x128xf32>, vector<16x128xf32> -> vector<16x128xf32>
    %c0_11 = arith.constant 0 : index
    %c0_12 = arith.constant 0 : index
    %11 = vector.load %arg5[%c0_11, %c0_12] : memref<1x128xf32, #tpu.memory_space<vmem>>, vector<1x128xf32>
    %12 = vector.broadcast %11 : vector<1x128xf32> to vector<16x128xf32>
    %13 = arith.addf %10, %12 : vector<16x128xf32>
    %c0_13 = arith.constant 0 : index
    %c0_14 = arith.constant 0 : index
    %14 = vector.load %arg7[%c0_13, %c0_14] : memref<16x128xf32, #tpu.memory_space<vmem>>, vector<16x128xf32>
    tpu.vector_store %arg7[%c0_13, %c0_14], %13 {strides = array<i32>} : memref<16x128xf32, #tpu.memory_space<vmem>>, vector<16x128xf32>,
    return
  }
  func.func @transform_0(%arg0: i32) -> (i32, i32) {
    %c0_i32 = arith.constant 0 : i32
    %c0_i32_0 = arith.constant 0 : i32
    return %arg0, %c0_i32 : i32, i32
  }
  func.func @transform_1(%arg0: i32) -> (i32, i32) {
    %c0_i32 = arith.constant 0 : i32
    %c0_i32_0 = arith.constant 0 : i32
    %c0_i32_1 = arith.constant 0 : i32
    return %c0_i32, %c0_i32_0 : i32, i32
  }
  func.func @transform_2(%arg0: i32) -> (i32, i32) {
    %c0_i32 = arith.constant 0 : i32
    %c0_i32_0 = arith.constant 0 : i32
    %c0_i32_1 = arith.constant 0 : i32
    return %c0_i32, %c0_i32_0 : i32, i32
  }
  func.func @transform_3(%arg0: i32) -> (i32, i32) {
    %c0_i32 = arith.constant 0 : i32
    %c0_i32_0 = arith.constant 0 : i32
    %c0_i32_1 = arith.constant 0 : i32
    return %c0_i32, %c0_i32_0 : i32, i32
  }
  func.func @transform_4(%arg0: i32) -> (i32, i32) {
    %c0_i32 = arith.constant 0 : i32
    %c0_i32_0 = arith.constant 0 : i32
    %c0_i32_1 = arith.constant 0 : i32
    return %c0_i32, %c0_i32_0 : i32, i32
  }
  func.func @transform_5(%arg0: i32) -> (i32, i32) {
    %c0_i32 = arith.constant 0 : i32
    %c0_i32_0 = arith.constant 0 : i32
    return %arg0, %c0_i32 : i32, i32
  }
  func.func @transform_6(%arg0: i32) -> (i32, i32) {
    %c0_i32 = arith.constant 0 : i32
    %c0_i32_0 = arith.constant 0 : i32
    return %arg0, %c0_i32 : i32, i32
  }
}

</mosaic_0001>

<bundles_post_ra>
// kernel: _fwd.1
= control target key start
LH: loop header
LB: loop body
LE: loop exit
PB: predicated region body
PF: predicated region fallthrough
CT: control target
= control target key end

     0   :  { %12 = vsyncpa [#allocation3], 0  ;;  %s608_s0 = inlined_call_operand.vmem [shape: f32[16,128], index: 0, kind: input, shape index: {}]   ;;  %s609_s1 = inlined_call_operand.hbm [shape: f32[128,256], index: 1, kind: input, shape index: {}]   ;;  %s610_s2 = inlined_call_operand.vmem [shape: f32[1,256], index: 2, kind: input, shape index: {}]   ;;  %s611_s3 = inlined_call_operand.hbm [shape: f32[256,128], index: 3, kind: input, shape index: {}]   ;;  %s612_s4 = inlined_call_operand.vmem [shape: f32[1,128], index: 4, kind: input, shape index: {}]   ;;  %s613_s5 = inlined_call_operand.hbm [shape: f32[16,256], index: 5, kind: output, shape index: {0}]   ;;  %s614_s6 = inlined_call_operand.vmem [shape: f32[16,128], index: 6, kind: output, shape index: {1}]  }
   0x1   :  { %13 = vsyncpa [#allocation6], 0 }
   0x2   :  { %14 = vsyncpa [#allocation4], 0  ;;  %s503_s21 = smov [#allocation2]   ;;  %s431_s25 = scalar_lea.hbm %s609_s1, 4096 }
   0x3   :  { %s22_s22 = sshll.u32 %s503_s21, 4  ;;  %p432_p0 = scmp.ne.s32.totalorder %s609_s1, %s431_s25  ;;  %s23_s22 = int_to_ptr.vmem [resolvable:$true] %s22_s22 }
   0x4   :  { %p435_p1 = scmp.lt.u32.totalorder %s431_s25, %s609_s1 }
   0x6   :  { %p437_p2 = pnand %p435_p1, %p432_p0 }
   0x8   :  { %440 = shalt.err (!%p437_p2)
}
   0x9   :  { %s441_s30 = scalar_lea.vmem %s23_s22, 4096  ;;  %p446_p4 = scmp.lt.s32.totalorder %s23_s22, %s23_s22 }
   0xa   :  { %p442_p3 = scmp.ne.s32.totalorder %s23_s22, %s441_s30  ;;  %p447_p5 = scmp.lt.s32.totalorder %s441_s30, %s441_s30 }
   0xc   :  { %p448_p6 = por %p447_p5, %p446_p4 }
   0xe   :  { %p449_p7 = pnand %p448_p6, %p442_p3 }
  0x10   :  { %452 = shalt.err (!%p449_p7)
}
  0x11   :  { %s504_s7 = smov 256   ;;  %s505_s8 = smov 16  }
  0x12   :  { %28 = dma.hbm_to_vmem [thread:$0]  %s609_s1, 4096, %s23_s22, [#allocation3], %s504_s7, %s504_s7, %s505_s8  }
  0x13   :  { %s506_s11 = smov [#allocation5]   ;;  %s453_s15 = scalar_lea.hbm %s611_s3, 4096 }
  0x14   :  { %s36_s12 = sshll.u32 %s506_s11, 4  ;;  %p454_p8 = scmp.ne.s32.totalorder %s611_s3, %s453_s15  ;;  %s37_s12 = int_to_ptr.vmem [resolvable:$true] %s36_s12 }
  0x15   :  { %p457_p9 = scmp.lt.u32.totalorder %s453_s15, %s611_s3 }
  0x17   :  { %p459_p10 = pnand %p457_p9, %p454_p8 }
  0x19   :  { %462 = shalt.err (!%p459_p10)
}
  0x1a   :  { %s463_s20 = scalar_lea.vmem %s37_s12, 4096  ;;  %p468_p12 = scmp.lt.s32.totalorder %s37_s12, %s37_s12 }
  0x1b   :  { %p464_p11 = scmp.ne.s32.totalorder %s37_s12, %s463_s20  ;;  %p469_p13 = scmp.lt.s32.totalorder %s463_s20, %s463_s20 }
  0x1d   :  { %p470_p0 = por %p469_p13, %p468_p12 }
  0x1f   :  { %p471_p1 = pnand %p470_p0, %p464_p11 }
  0x21   :  { %474 = shalt.err (!%p471_p1)
}
  0x22   :  { %s507_s1 = smov 128   ;;  %s508_s21 = smov 8  }
  0x23   :  { %42 = dma.hbm_to_vmem [thread:$0]  %s611_s3, 4096, %s37_s12, [#allocation6], %s507_s1, %s507_s1, %s508_s21  }
  0x24   :  { %497 = dma.done.wait [#allocation3], 4096  }
  0x25   :  { %498 = vsyncadd [#allocation3], 4294963200 }
  0x26   :  { %499 = dma.done.wait [#allocation6], 4096  }
  0x27   :  { %500 = vsyncadd [#allocation6], 4294963200  ;;  %v509_v0 = vmov 0.0   ;;  %v54_v1 = vld [vmem:[#allocation2 + $0x8] sm:$0xff]  ;;  %v56_v2 = vld [vmem:[#allocation2 + $0x18] sm:$0xff] }
  0x28   :  { %161 = vmatprep.mubr.f32.mxu0 %v509_v0  ;;  %v53_v3 = vld [vmem:[#allocation2] sm:$0xff]  ;;  %v359_v4 = vpack.c.bf16 %v56_v2, %v54_v1  ;;  %v55_v5 = vld [vmem:[#allocation2 + $0x10] sm:$0xff]  ;;  %v58_v6 = vld [vmem:[#allocation2 + $0x28] sm:$0xff] }
  0x29   :  { %v60_v7 = vld [vmem:[#allocation2 + $0x38] sm:$0xff]  ;;  %v361_v8 = vpack.c.bf16 %v55_v5, %v53_v3  ;;  %v57_v10 = vld [vmem:[#allocation2 + $0x20] sm:$0xff]  ;;  %v59_v11 = vld [vmem:[#allocation2 + $0x30] sm:$0xff] }
  0x2a   :  { %v363_v9 = vpack.c.bf16 %v60_v7, %v58_v6  ;;  %v62_v12 = vld [vmem:[#allocation2 + $0x48] sm:$0xff]  ;;  %360 = vmatprep.subr.bf16.mxu0 %v359_v4  ;;  %v64_v13 = vld [vmem:[#allocation2 + $0x58] sm:$0xff]  ;;  %v365_v14 = vpack.c.bf16 %v59_v11, %v57_v10  ;;  %v61_v16 = vld [vmem:[#allocation2 + $0x40] sm:$0xff] }
  0x2b   :  { %362 = vmatpush1.bf16.msra.mxu0 %v361_v8  ;;  %v367_v15 = vpack.c.bf16 %v64_v13, %v62_v12  ;;  %v63_v17 = vld [vmem:[#allocation2 + $0x50] sm:$0xff]  ;;  %v66_v18 = vld [vmem:[#allocation2 + $0x68] sm:$0xff]  ;;  %v68_v19 = vld [vmem:[#allocation2 + $0x78] sm:$0xff] }
  0x2c   :  { %364 = vmatprep.subr.bf16.mxu0 %v363_v9  ;;  %v369_v20 = vpack.c.bf16 %v63_v17, %v61_v16  ;;  %v371_v21 = vpack.c.bf16 %v68_v19, %v66_v18  ;;  %v65_v22 = vld [vmem:[#allocation2 + $0x60] sm:$0xff]  ;;  %v67_v23 = vld [vmem:[#allocation2 + $0x70] sm:$0xff]  ;;  %v70_v24 = vld [vmem:[#allocation2 + $0x88] sm:$0xff] }
  0x2d   :  { %v72_v25 = vld [vmem:[#allocation2 + $0x98] sm:$0xff]  ;;  %v69_v26 = vld [vmem:[#allocation2 + $0x80] sm:$0xff]  ;;  %v71_v27 = vld [vmem:[#allocation2 + $0x90] sm:$0xff]  ;;  %v373_v30 = vpack.c.bf16 %v67_v23, %v65_v22 }
  0x2e   :  { %v198_v28 = vld [vmem:[#allocation5 + $0x80] sm:$0xff]  ;;  %v199_v29 = vld [vmem:[#allocation5 + $0x88] sm:$0xff]  ;;  %v200_v35 = vld [vmem:[#allocation5 + $0x90] sm:$0xff]  ;;  %v375_v36 = vpack.c.bf16 %v72_v25, %v70_v24  ;;  %v377_v46 = vpack.c.bf16 %v71_v27, %v69_v26 }
  0x2f   :  { %366 = vmatpush1.bf16.msra.mxu0 %v365_v14  ;;  %v74_v31 = vld [vmem:[#allocation2 + $0xa8] sm:$0xff]  ;;  %v391_v32 = vpack.c.bf16 %v199_v29, %v198_v28  ;;  %v182_v33 = vld [vmem:[#allocation5] sm:$0xff]  ;;  %v201_v38 = vld [vmem:[#allocation5 + $0x98] sm:$0xff] }
  0x30   :  { %368 = vmatprep.subr.bf16.mxu0 %v367_v15  ;;  %v183_v34 = vld [vmem:[#allocation5 + $0x8] sm:$0xff]  ;;  %v184_v39 = vld [vmem:[#allocation5 + $0x10] sm:$0xff]  ;;  %v185_v40 = vld [vmem:[#allocation5 + $0x18] sm:$0xff]  ;;  %v395_v42 = vpack.c.bf16 %v201_v38, %v200_v35 }
  0x31   :  { %v393_v37 = vpack.c.bf16 %v183_v34, %v182_v33  ;;  %v76_v41 = vld [vmem:[#allocation2 + $0xb8] sm:$0xff]  ;;  %392 = vmatprep.subr.bf16.mxu1 %v391_v32  ;;  %v202_v43 = vld [vmem:[#allocation5 + $0xa0] sm:$0xff]  ;;  %v203_v44 = vld [vmem:[#allocation5 + $0xa8] sm:$0xff]  ;;  %v397_v45 = vpack.c.bf16 %v185_v40, %v184_v39 }
  0x32   :  { %v73_v47 = vld [vmem:[#allocation2 + $0xa0] sm:$0xff]  ;;  %v399_v48 = vpack.c.bf16 %v203_v44, %v202_v43  ;;  %v187_v50 = vld [vmem:[#allocation5 + $0x28] sm:$0xff]  ;;  %v379_v51 = vpack.c.bf16 %v76_v41, %v74_v31  ;;  %v75_v52 = vld [vmem:[#allocation2 + $0xb0] sm:$0xff] }
  0x33   :  { %370 = vmatpush1.bf16.msra.mxu0 %v369_v20  ;;  %394 = vmatpush3.bf16.msra.mxu1 %v393_v37  ;;  %v186_v49 = vld [vmem:[#allocation5 + $0x20] sm:$0xff]  ;;  %v204_v53 = vld [vmem:[#allocation5 + $0xb0] sm:$0xff]  ;;  %v205_v54 = vld [vmem:[#allocation5 + $0xb8] sm:$0xff]  ;;  %v381_v58 = vpack.c.bf16 %v75_v52, %v73_v47 }
  0x34   :  { %372 = vmatprep.subr.bf16.mxu0 %v371_v21  ;;  %396 = vmatprep.subr.bf16.mxu1 %v395_v42  ;;  %v78_v55 = vld [vmem:[#allocation2 + $0xc8] sm:$0xff]  ;;  %v80_v56 = vld [vmem:[#allocation2 + $0xd8] sm:$0xff]  ;;  %v401_v57 = vpack.c.bf16 %v187_v50, %v186_v49  ;;  %v77_v59 = vld [vmem:[#allocation2 + $0xc0] sm:$0xff]  ;;  %v403_v60 = vpack.c.bf16 %v205_v54, %v204_v53 }
  0x35   :  { %v188_v61 = vld [vmem:[#allocation5 + $0x30] sm:$0xff]  ;;  %v189_v62 = vld [vmem:[#allocation5 + $0x38] sm:$0xff]  ;;  %v383_v63 = vpack.c.bf16 %v80_v56, %v78_v55  ;;  %v206_v2 = vld [vmem:[#allocation5 + $0xc0] sm:$0xff] }
  0x36   :  { %v79_v1 = vld [vmem:[#allocation2 + $0xd0] sm:$0xff]  ;;  %v207_v3 = vld [vmem:[#allocation5 + $0xc8] sm:$0xff]  ;;  %v84_v5 = vld [vmem:[#allocation2 + $0xf8] sm:$0xff]  ;;  %v405_v6 = vpack.c.bf16 %v189_v62, %v188_v61 }
  0x37   :  { %374 = vmatpush1.bf16.msra.mxu0 %v373_v30  ;;  %398 = vmatpush3.bf16.msra.mxu1 %v397_v45  ;;  %v82_v4 = vld [vmem:[#allocation2 + $0xe8] sm:$0xff]  ;;  %v385_v7 = vpack.c.bf16 %v79_v1, %v77_v59  ;;  %v81_v8 = vld [vmem:[#allocation2 + $0xe0] sm:$0xff]  ;;  %v407_v9 = vpack.c.bf16 %v207_v3, %v206_v2  ;;  %v83_v13 = vld [vmem:[#allocation2 + $0xf0] sm:$0xff] }
  0x38   :  { %376 = vmatprep.subr.bf16.mxu0 %v375_v36  ;;  %400 = vmatprep.subr.bf16.mxu1 %v399_v48  ;;  %v190_v10 = vld [vmem:[#allocation5 + $0x40] sm:$0xff]  ;;  %v191_v11 = vld [vmem:[#allocation5 + $0x48] sm:$0xff]  ;;  %v387_v12 = vpack.c.bf16 %v84_v5, %v82_v4  ;;  %v208_v14 = vld [vmem:[#allocation5 + $0xd0] sm:$0xff]  ;;  %v389_v17 = vpack.c.bf16 %v83_v13, %v81_v8  ;;  %v87_v36 = vlaneseq }
  0x39   :  { %v209_v15 = vld [vmem:[#allocation5 + $0xd8] sm:$0xff]  ;;  %v409_v16 = vpack.c.bf16 %v191_v11, %v190_v10  ;;  %v192_v19 = vld [vmem:[#allocation5 + $0x50] sm:$0xff]  ;;  %v210_v21 = vld [vmem:[#allocation5 + $0xe0] sm:$0xff] }
  0x3a   :  { %v411_v18 = vpack.c.bf16 %v209_v15, %v208_v14  ;;  %v193_v20 = vld [vmem:[#allocation5 + $0x58] sm:$0xff]  ;;  %v211_v22 = vld [vmem:[#allocation5 + $0xe8] sm:$0xff]  ;;  %v51_v24 = vld [vmem:[%s608_s0] sm:$0xff] }
  0x3b   :  { %378 = vmatpush1.bf16.msra.mxu0 %v377_v46  ;;  %402 = vmatpush3.bf16.msra.mxu1 %v401_v57  ;;  %v413_v23 = vpack.c.bf16 %v193_v20, %v192_v19  ;;  %v415_v25 = vpack.c.bf16 %v211_v22, %v210_v21  ;;  %v52_v26 = vld [vmem:[%s608_s0 + $0x8] sm:$0xff]  ;;  %v194_v27 = vld [vmem:[#allocation5 + $0x60] sm:$0xff]  ;;  %v212_v30 = vld [vmem:[#allocation5 + $0xf0] sm:$0xff]  ;;  %s510_s0 = smov [#allocation7]  }
  0x3c   :  { %380 = vmatprep.subr.bf16.mxu0 %v379_v51  ;;  %404 = vmatprep.subr.bf16.mxu1 %v403_v60  ;;  %v195_v28 = vld [vmem:[#allocation5 + $0x68] sm:$0xff]  ;;  %v213_v31 = vld [vmem:[#allocation5 + $0xf8] sm:$0xff]  ;;  %v196_v33 = vld [vmem:[#allocation5 + $0x70] sm:$0xff] }
  0x3d   :  { %v417_v29 = vpack.c.bf16 %v195_v28, %v194_v27  ;;  %v419_v32 = vpack.c.bf16 %v213_v31, %v212_v30  ;;  %v197_v34 = vld [vmem:[#allocation5 + $0x78] sm:$0xff]  ;;  %v85_v38 = vld [vmem:[%s610_s2] sm:$0x3]  ;;  %s303_s2 = sshll.u32 %s510_s0, 4  ;;  %s304_s2 = int_to_ptr.vmem [resolvable:$true] %s303_s2 }
  0x3e   :  { %v421_v35 = vpack.c.bf16 %v197_v34, %v196_v33  ;;  %s475_s29 = scalar_lea.vmem %s304_s2, 512  ;;  %p480_p3 = scmp.lt.s32.totalorder %s304_s2, %s304_s2 }
  0x3f   :  { %382 = vmatpush1.bf16.msra.mxu0 %v381_v58  ;;  %406 = vmatpush3.bf16.msra.mxu1 %v405_v6  ;;  %p476_p2 = scmp.ne.s32.totalorder %s304_s2, %s475_s29  ;;  %p481_p4 = scmp.lt.s32.totalorder %s475_s29, %s475_s29 }
  0x40   :  { %384 = vmatprep.subr.bf16.mxu0 %v383_v63  ;;  %408 = vmatprep.subr.bf16.mxu1 %v407_v9 }
  0x41   :  { %p482_p5 = por %p481_p4, %p480_p3 }
  0x43   :  { %386 = vmatpush1.bf16.msra.mxu0 %v385_v7  ;;  %410 = vmatpush3.bf16.msra.mxu1 %v409_v16  ;;  %p483_p6 = pnand %p482_p5, %p476_p2 }
  0x44   :  { %388 = vmatprep.subr.bf16.mxu0 %v387_v12  ;;  %412 = vmatprep.subr.bf16.mxu1 %v411_v18 }
  0x47   :  { %390 = vmatpush1.bf16.msra.mxu0 %v389_v17  ;;  %414 = vmatpush3.bf16.msra.mxu1 %v413_v23 }
  0x48   :  { %416 = vmatprep.subr.bf16.mxu1 %v415_v25 }
  0x4a   :  { %162 = vmatmul.mubr.f32.vlgmr.msra.gmra.mrb[0].mxu0 %v51_v24 }
  0x4b   :  { %167 = vmatprep.mubr.f32.mxu0 %v509_v0  ;;  %418 = vmatpush3.bf16.msra.mxu1 %v417_v29  ;;  %v88_v0 = vshrl.u32 %v87_v36, 7 }
  0x4c   :  { %420 = vmatprep.subr.bf16.mxu1 %v419_v32 }
  0x4d   :  { %v89_v37 = vsub.s32 0, %v88_v0  ;;  %v93_v39 = vsub.s32 1, %v88_v0 }
  0x4e   :  { %168 = vmatmul.mubr.f32.gmra.mrb[2].mxu0 %v52_v26 }
  0x4f   :  { %422 = vmatpush3.bf16.msra.mxu1 %v421_v35  ;;  %v90_v40 = vrot.slane %v85_v38, %v89_v37  ;;  %v94_v41 = vrot.slane %v85_v38, %v93_v39 }
 0x11d   :  { %v163_v42 = vpop.f32.mrb[0].mxu0 }
 0x11e   :  { %v164_v43 = vadd.f32 %v163_v42, %v90_v40  ;;  %v165_v44 = vpop.f32.mrb[1].mxu0 }
 0x11f   :  { %v166_v45 = vadd.f32 %v165_v44, %v94_v41 }
 0x120   :  { %v174_v46 = vmax.f32 %v164_v43, 0.0 }
 0x121   :  { %v175_v47 = vmax.f32 %v166_v45, 0.0  ;;  %v169_v48 = vpop.f32.mrb[2].mxu0 }
 0x122   :  { %178 = vst [vmem:[#allocation7] sm:$0xff] %v174_v46  ;;  %v170_v49 = vadd.f32 %v169_v48, %v90_v40  ;;  %v171_v50 = vpop.f32.mrb[3].mxu0 }
 0x123   :  { %179 = vst [vmem:[#allocation7 + $0x8] sm:$0xff] %v175_v47  ;;  %v172_v51 = vadd.f32 %v171_v50, %v94_v41  ;;  %285 = vmatprep.mubr.f32.mxu1 %v175_v47 }
 0x124   :  { %v176_v52 = vmax.f32 %v170_v49, 0.0  ;;  %286 = vmatmul.mubr.f32.vlgmr.msra.gmra.mrb[0].mxu1 %v174_v46 }
 0x125   :  { %v177_v53 = vmax.f32 %v172_v51, 0.0 }
 0x126   :  { %180 = vst [vmem:[#allocation7 + $0x10] sm:$0xff] %v176_v52 }
 0x127   :  { %181 = vst [vmem:[#allocation7 + $0x18] sm:$0xff] %v177_v53  ;;  %290 = vmatprep.mubr.f32.mxu1 %v177_v53 }
 0x128   :  { %291 = vmatmul.mubr.f32.gmra.mrb[2].mxu1 %v176_v52 }
 0x129   :  { %486 = shalt.err (!%p483_p6)
}
 0x12a   :  { %s487_s10 = scalar_lea.hbm %s613_s5, 512 }
 0x12b   :  { %p488_p7 = scmp.ne.s32.totalorder %s613_s5, %s487_s10  ;;  %p491_p8 = scmp.lt.u32.totalorder %s487_s10, %s613_s5 }
 0x12d   :  { %p493_p9 = pnand %p491_p8, %p488_p7 }
 0x12f   :  { %496 = shalt.err (!%p493_p9)
}
 0x130   :  { %309 = dma.vmem_to_hbm [thread:$0]  %s304_s2, 512, %s613_s5, [#allocation4], %s504_s7, %s504_s7, %s505_s8  }
 0x131   :  { %v320_v55 = vld [vmem:[%s612_s4] ss:$0 sm:$0xff] }
 0x1f7   :  { %v353_v54 = vpop.f32.mrb[0].mxu1 }
 0x1f8   :  { %v354_v56 = vpop.f32.mrb[1].mxu1 }
 0x1f9   :  { %v355_v57 = vadd.f32 %v354_v56, %v353_v54 }
 0x1fb   :  { %v288_v58 = vadd.f32 %v355_v57, %v320_v55  ;;  %v356_v59 = vpop.f32.mrb[2].mxu1 }
 0x1fc   :  { %v357_v60 = vpop.f32.mrb[3].mxu1 }
 0x1fd   :  { %296 = vst [vmem:[%s614_s6] sm:$0xff] %v288_v58  ;;  %v358_v61 = vadd.f32 %v357_v60, %v356_v59 }
 0x1ff   :  { %v293_v62 = vadd.f32 %v358_v61, %v320_v55 }
 0x201   :  { %297 = vst [vmem:[%s614_s6 + $0x8] sm:$0xff] %v293_v62 }
 0x202   :  { %501 = dma.done.wait [#allocation4], 512  }
 0x203   :  { %502 = vsyncadd [#allocation4], 4294966784 }
 0x204   :  { %317 = vsyncpa [#allocation3], 1 }
 0x205   :  { %318 = vsyncpa [#allocation6], 1 }
 0x206   :  { %319 = vsyncpa [#allocation4], 1 }

</bundles_post_ra>
